<compile_context>
chip_gen: v7x
topology: tpu7x:2x2x1
jax: 0.10.0
libtpu: 0.0.40
codegen_flags: <defaults>
</compile_context>

<pallas_src>
import jax
import jax.numpy as jnp
import numpy as np
from jax.experimental import pallas as pl
from jax.experimental.pallas import tpu as pltpu

NEG_SLOPE = 0.01      # nn.LeakyReLU default
LN_EPS = 1e-5         # nn.LayerNorm default


# ----------------------------- Pallas kernels ------------------------------

def _conv_pool_ln_lrelu_kernel(a_ref, b_ref, g_ref, be_ref, o_ref):
    """Per-sample fused: conv-as-matmul -> 2x2 maxpool -> LayerNorm -> LeakyReLU.

    a_ref : (Cout, Kp)      bf16   conv weights (K padded)
    b_ref : (Kp, 4*P)       bf16   im2col patches, columns ordered (tap, ho, wo)
    g_ref : (Cout, P)       f32    LayerNorm gamma
    be_ref: (Cout, P)       f32    LayerNorm beta
    o_ref : (Cout, P)       f32    output
    """
    s = jnp.dot(a_ref[...], b_ref[...],
                preferred_element_type=jnp.float32)            # (Cout, 4P)
    P = s.shape[1] // 4
    # 2x2 max-pool: the four taps of every window are contiguous lane slabs.
    m = jnp.maximum(jnp.maximum(s[:, 0 * P:1 * P], s[:, 1 * P:2 * P]),
                    jnp.maximum(s[:, 2 * P:3 * P], s[:, 3 * P:4 * P]))
    # LayerNorm over the whole (C, Ho, Wo) extent of this sample (f32 stats).
    mu = jnp.mean(jnp.mean(m, axis=1, keepdims=True), axis=0, keepdims=True)
    d = m - mu
    var = jnp.mean(jnp.mean(d * d, axis=1, keepdims=True), axis=0, keepdims=True)
    y = d * jax.lax.rsqrt(var + LN_EPS) * g_ref[...] + be_ref[...]
    o_ref[...] = jnp.maximum(y, NEG_SLOPE * y)                 # LeakyReLU


def _head_kernel(t_ref, w1_ref, b1_ref, w2_ref, b2_ref, o_ref):
    """Fused MaxPool(2,2) -> Flatten -> Linear -> LeakyReLU -> Linear.

    t_ref : (4, Nt, D) f32  -- the four pool taps, features already C-major
    """
    m = jnp.maximum(jnp.maximum(t_ref[0], t_ref[1]),
                    jnp.maximum(t_ref[2], t_ref[3]))           # (Nt, D)
    h1 = jnp.dot(m, w1_ref[...],
                 preferred_element_type=jnp.float32) + b1_ref[...]
    h1 = jnp.maximum(h1, NEG_SLOPE * h1)                       # LeakyReLU
    o_ref[...] = jnp.dot(h1, w2_ref[...],
                         preferred_element_type=jnp.float32) + b2_ref[...]


# ------------------------------ host wrappers -------------------------------

def conv_pool_ln_lrelu(x, w, gamma, beta):
    """Conv2d(3x3, stride 1, pad 1, no bias) -> MaxPool2d(2,2) -> LayerNorm -> LeakyReLU.

    x     : (N, Cin, H, W) f32
    w     : (Cout, Cin, 3, 3)
    gamma/beta: (Cout, H//2, W//2)
    returns (N, Cout, H//2, W//2) f32
    """
    N, Cin, H, W = x.shape
    Cout = w.shape[0]
    Ho, Wo = H // 2, W // 2
    P = Ho * Wo
    K = Cin * 9
    Kp = ((K + 7) // 8) * 8          # pad contraction dim to a sublane multiple

    # ---- host-side layout glue (pure data movement; no FLOPs) ----
    xp = jnp.pad(x, ((0, 0), (0, 0), (1, 1), (1, 1)))
    taps = jnp.stack([xp[:, :, kh:kh + H, kw:kw + W]
                      for kh in range(3) for kw in range(3)], axis=2)   # (N,Cin,9,H,W)
    # rows ordered (ci, kh, kw) to match w.reshape(Cout, Cin*9);
    # columns ordered (tap=(i,j), ho, wo) so the in-kernel pool is slab-wise.
    b = taps.reshape(N, K, Ho, 2, Wo, 2)
    b = b.transpose(0, 1, 3, 5, 2, 4).reshape(N, K, 4 * P)
    b = jnp.pad(b, ((0, 0), (0, Kp - K), (0, 0))).astype(jnp.bfloat16)
    a = jnp.pad(w.reshape(Cout, K).astype(jnp.float32),
                ((0, 0), (0, Kp - K))).astype(jnp.bfloat16)
    g = gamma.reshape(Cout, P).astype(jnp.float32)
    be = beta.reshape(Cout, P).astype(jnp.float32)

    out = pl.pallas_call(
        _conv_pool_ln_lrelu_kernel,
        out_shape=jax.ShapeDtypeStruct((N, Cout, P), jnp.float32),
        grid=(N,),
        in_specs=[pl.BlockSpec((Cout, Kp), lambda i: (0, 0)),
                  pl.BlockSpec((None, Kp, 4 * P), lambda i: (i, 0, 0)),
                  pl.BlockSpec((Cout, P), lambda i: (0, 0)),
                  pl.BlockSpec((Cout, P), lambda i: (0, 0))],
        out_specs=pl.BlockSpec((None, Cout, P), lambda i: (i, 0, 0)),
        compiler_params=pltpu.CompilerParams(
            dimension_semantics=("parallel",)),
    )(a, b, g, be)
    return out.reshape(N, Cout, Ho, Wo)


def _pick_tile(n, candidates=(256, 128, 64, 32, 16, 8)):
    for c in candidates:
        if n % c == 0:
            return c
    return n


def pool_fc_head(h, fc1_w, fc1_b, fc2_w, fc2_b):
    """MaxPool2d(2,2) -> Flatten -> Linear(512,64) -> LeakyReLU -> Linear(64,10)."""
    N, C, H, W = h.shape
    Ho, Wo = H // 2, W // 2
    D = C * Ho * Wo
    hid = fc1_w.shape[0]
    n_out = fc2_w.shape[0]

    # Stack the four pool taps into ONE array (single BlockSpec / pipeline);
    # feature axis is C-major (c, ho, wo), matching nn.Flatten of NCHW.
    t = h.reshape(N, C, Ho, 2, Wo, 2).transpose(3, 5, 0, 1, 2, 4)
    t = t.reshape(4, N, D).astype(jnp.float32)
    w1 = fc1_w.T.astype(jnp.float32)                 # (D, hid)
    w2 = fc2_w.T.astype(jnp.float32)                 # (hid, n_out)

    Nt = _pick_tile(N)
    return pl.pallas_call(
        _head_kernel,
        out_shape=jax.ShapeDtypeStruct((N, n_out), jnp.float32),
        grid=(N // Nt,),
        in_specs=[pl.BlockSpec((4, Nt, D), lambda n: (0, n, 0)),
                  pl.BlockSpec((D, hid), lambda n: (0, 0)),
                  pl.BlockSpec((1, hid), lambda n: (0, 0)),
                  pl.BlockSpec((hid, n_out), lambda n: (0, 0)),
                  pl.BlockSpec((1, n_out), lambda n: (0, 0))],
        out_specs=pl.BlockSpec((Nt, n_out), lambda n: (n, 0)),
        compiler_params=pltpu.CompilerParams(
            dimension_semantics=("parallel",)),
    )(t, w1, fc1_b.reshape(1, hid).astype(jnp.float32),
      w2, fc2_b.reshape(1, n_out).astype(jnp.float32))


# ------------------------------ full forward -------------------------------

def cnn_forward(x, p):
    x = x.reshape(-1, 3, 32, 32).astype(jnp.float32)             # x.view(-1,3,32,32)
    h = conv_pool_ln_lrelu(x, p["conv1_w"], p["ln1_g"], p["ln1_b"])   # (N,16,16,16)
    h = conv_pool_ln_lrelu(h, p["conv2_w"], p["ln2_g"], p["ln2_b"])   # (N,32, 8, 8)
    return pool_fc_head(h, p["fc1_w"], p["fc1_b"], p["fc2_w"], p["fc2_b"])  # (N,10)


# -------------------------- params & JAX reference -------------------------

def init_params(key):
    ks = jax.random.split(key, 8)

    def nrm(k, shape, fan_in):
        return jax.random.normal(k, shape, jnp.float32) / jnp.sqrt(fan_in)

    return {
        "conv1_w": nrm(ks[0], (16, 3, 3, 3), 3 * 9),
        "ln1_g": 1.0 + 0.1 * jax.random.normal(ks[1], (16, 16, 16), jnp.float32),
        "ln1_b": 0.1 * jax.random.normal(ks[2], (16, 16, 16), jnp.float32),
        "conv2_w": nrm(ks[3], (32, 16, 3, 3), 16 * 9),
        "ln2_g": 1.0 + 0.1 * jax.random.normal(ks[4], (32, 8, 8), jnp.float32),
        "ln2_b": 0.1 * jax.random.normal(ks[5], (32, 8, 8), jnp.float32),
        "fc1_w": nrm(ks[6], (64, 512), 512),
        "fc1_b": jnp.full((64,), 0.01, jnp.float32),
        "fc2_w": nrm(ks[7], (10, 64), 64),
        "fc2_b": jnp.zeros((10,), jnp.float32),
    }


def ref_forward(x, p):
    x = x.reshape(-1, 3, 32, 32).astype(jnp.float32)

    def conv(h, w):
        return jax.lax.conv_general_dilated(
            h, w, (1, 1), ((1, 1), (1, 1)),
            dimension_numbers=("NCHW", "OIHW", "NCHW"))

    def maxpool(h):
        return jax.lax.reduce_window(h, -jnp.inf, jax.lax.max,
                                     (1, 1, 2, 2), (1, 1, 2, 2), "VALID")

    def ln(h, g, b):
        m = h.mean(axis=(1, 2, 3), keepdims=True)
        v = ((h - m) ** 2).mean(axis=(1, 2, 3), keepdims=True)
        return (h - m) / jnp.sqrt(v + LN_EPS) * g[None] + b[None]

    def lrelu(h):
        return jnp.where(h >= 0, h, NEG_SLOPE * h)

    h = lrelu(ln(maxpool(conv(x, p["conv1_w"])), p["ln1_g"], p["ln1_b"]))
    h = lrelu(ln(maxpool(conv(h, p["conv2_w"])), p["ln2_g"], p["ln2_b"]))
    h = maxpool(h).reshape(h.shape[0], -1)
    h = lrelu(h @ p["fc1_w"].T + p["fc1_b"])
    return h @ p["fc2_w"].T + p["fc2_b"]


if __name__ == "__main__":
    key = jax.random.PRNGKey(0)
    pkey, xkey = jax.random.split(key)
    params = init_params(pkey)
    x = jax.random.normal(xkey, (2, 3, 32, 32), jnp.float32)

    out = jax.jit(cnn_forward)(x, params)
    out = jax.block_until_ready(out)
    assert out.shape == (2, 10), out.shape

    ref = jax.block_until_ready(ref_forward(x, params))
    np.testing.assert_allclose(np.asarray(out), np.asarray(ref),
                               rtol=2e-2, atol=2e-2)
    print("KERNEL_OK")
</pallas_src>

<mosaic_0001>
module attributes {stable_mosaic.version = 11 : i64} {
  func.func @_conv_pool_ln_lrelu_kernel(%arg0: i32, %arg1: memref<16x32xbf16, #tpu.memory_space<vmem>>, %arg2: memref<1x32x1024xbf16, #tpu.memory_space<vmem>>, %arg3: memref<16x256xf32, #tpu.memory_space<vmem>>, %arg4: memref<16x256xf32, #tpu.memory_space<vmem>>, %arg5: memref<1x16x256xf32, #tpu.memory_space<vmem>>) attributes {dimension_semantics = [#tpu.dimension_semantics<parallel>], iteration_bounds = array<i64: 2>, scalar_prefetch = 0 : i64, scratch_operands = 0 : i64, tpu.core_type = #tpu.core_type<tc>, window_params = [{pipeline_mode = #tpu.pipeline_mode<synchronous>, transform_indices = @transform_0, window_bounds = array<i64: 16, 32>}, {transform_indices = @transform_1, window_bounds = array<i64: 1, 32, 1024>}, {pipeline_mode = #tpu.pipeline_mode<synchronous>, transform_indices = @transform_2, window_bounds = array<i64: 16, 256>}, {pipeline_mode = #tpu.pipeline_mode<synchronous>, transform_indices = @transform_3, window_bounds = array<i64: 16, 256>}, {transform_indices = @transform_4, window_bounds = array<i64: 1, 16, 256>}]} {
    %c0 = arith.constant 0 : index
    %c0_0 = arith.constant 0 : index
    %0 = vector.load %arg1[%c0, %c0_0] : memref<16x32xbf16, #tpu.memory_space<vmem>>, vector<16x32xbf16>
    %c0_1 = arith.constant 0 : index
    %c0_2 = arith.constant 0 : index
    %c0_3 = arith.constant 0 : index
    %1 = vector.load %arg2[%c0_1, %c0_2, %c0_3] : memref<1x32x1024xbf16, #tpu.memory_space<vmem>>, vector<1x32x1024xbf16>
    %2 = vector.shape_cast %1 : vector<1x32x1024xbf16> to vector<32x1024xbf16>
    %cst = arith.constant dense<0.000000e+00> : vector<16x1024xf32>
    %3 = tpu.matmul %0, %2, %cst {dimension_numbers = #tpu.dot_dimension_numbers<[1], [0], [0], [1], [0, 0, 1, 1], [], []>} : vector<16x32xbf16>, vector<32x1024xbf16>, vector<16x1024xf32> -> vector<16x1024xf32>
    %4 = vector.extract_strided_slice %3 {offsets = [0, 0], sizes = [16, 256], strides = [1, 1]} : vector<16x1024xf32> to vector<16x256xf32>
    %5 = vector.extract_strided_slice %3 {offsets = [0, 256], sizes = [16, 256], strides = [1, 1]} : vector<16x1024xf32> to vector<16x256xf32>
    %6 = arith.maximumf %4, %5 : vector<16x256xf32>
    %7 = vector.extract_strided_slice %3 {offsets = [0, 512], sizes = [16, 256], strides = [1, 1]} : vector<16x1024xf32> to vector<16x256xf32>
    %8 = vector.extract_strided_slice %3 {offsets = [0, 768], sizes = [16, 256], strides = [1, 1]} : vector<16x1024xf32> to vector<16x256xf32>
    %9 = arith.maximumf %7, %8 : vector<16x256xf32>
    %10 = arith.maximumf %6, %9 : vector<16x256xf32>
    %cst_4 = arith.constant dense<0.000000e+00> : vector<16xf32>
    %11 = vector.multi_reduction <add>, %10, %cst_4 [1] : vector<16x256xf32> to vector<16xf32>
    %12 = vector.shape_cast %11 : vector<16xf32> to vector<16x1xf32>
    %cst_5 = arith.constant 2.560000e+02 : f32
    %13 = vector.broadcast %cst_5 : f32 to vector<16x1xf32>
    %14 = arith.divf %12, %13 : vector<16x1xf32>
    %cst_6 = arith.constant dense<0.000000e+00> : vector<1xf32>
    %15 = vector.multi_reduction <add>, %14, %cst_6 [0] : vector<16x1xf32> to vector<1xf32>
    %16 = vector.shape_cast %15 : vector<1xf32> to vector<1x1xf32>
    %cst_7 = arith.constant 1.600000e+01 : f32
    %17 = vector.broadcast %cst_7 : f32 to vector<1x1xf32>
    %18 = arith.divf %16, %17 : vector<1x1xf32>
    %19 = vector.broadcast %18 : vector<1x1xf32> to vector<16x256xf32>
    %20 = arith.subf %10, %19 : vector<16x256xf32>
    %21 = arith.mulf %20, %20 : vector<16x256xf32>
    %cst_8 = arith.constant dense<0.000000e+00> : vector<16xf32>
    %22 = vector.multi_reduction <add>, %21, %cst_8 [1] : vector<16x256xf32> to vector<16xf32>
    %23 = vector.shape_cast %22 : vector<16xf32> to vector<16x1xf32>
    %cst_9 = arith.constant 2.560000e+02 : f32
    %24 = vector.broadcast %cst_9 : f32 to vector<16x1xf32>
    %25 = arith.divf %23, %24 : vector<16x1xf32>
    %cst_10 = arith.constant dense<0.000000e+00> : vector<1xf32>
    %26 = vector.multi_reduction <add>, %25, %cst_10 [0] : vector<16x1xf32> to vector<1xf32>
    %27 = vector.shape_cast %26 : vector<1xf32> to vector<1x1xf32>
    %cst_11 = arith.constant 1.600000e+01 : f32
    %28 = vector.broadcast %cst_11 : f32 to vector<1x1xf32>
    %29 = arith.divf %27, %28 : vector<1x1xf32>
    %cst_12 = arith.constant 9.99999974E-6 : f32
    %30 = vector.broadcast %cst_12 : f32 to vector<1x1xf32>
    %31 = arith.addf %29, %30 : vector<1x1xf32>
    %32 = math.rsqrt %31 : vector<1x1xf32>
    %33 = vector.broadcast %32 : vector<1x1xf32> to vector<16x256xf32>
    %34 = arith.mulf %20, %33 : vector<16x256xf32>
    %c0_13 = arith.constant 0 : index
    %c0_14 = arith.constant 0 : index
    %35 = vector.load %arg3[%c0_13, %c0_14] : memref<16x256xf32, #tpu.memory_space<vmem>>, vector<16x256xf32>
    %36 = arith.mulf %34, %35 : vector<16x256xf32>
    %c0_15 = arith.constant 0 : index
    %c0_16 = arith.constant 0 : index
    %37 = vector.load %arg4[%c0_15, %c0_16] : memref<16x256xf32, #tpu.memory_space<vmem>>, vector<16x256xf32>
    %38 = arith.addf %36, %37 : vector<16x256xf32>
    %cst_17 = arith.constant 0.00999999977 : f32
    %39 = vector.broadcast %cst_17 : f32 to vector<16x256xf32>
    %40 = arith.mulf %39, %38 : vector<16x256xf32>
    %41 = arith.maximumf %38, %40 : vector<16x256xf32>
    %c0_18 = arith.constant 0 : index
    %c0_19 = arith.constant 0 : index
    %c0_20 = arith.constant 0 : index
    %42 = vector.load %arg5[%c0_18, %c0_19, %c0_20] : memref<1x16x256xf32, #tpu.memory_space<vmem>>, vector<1x16x256xf32>
    %43 = vector.shape_cast %42 : vector<1x16x256xf32> to vector<16x256xf32>
    %44 = vector.shape_cast %41 : vector<16x256xf32> to vector<1x16x256xf32>
    tpu.vector_store %arg5[%c0_18, %c0_19, %c0_20], %44 {strides = array<i32>} : memref<1x16x256xf32, #tpu.memory_space<vmem>>, vector<1x16x256xf32>,
    return
  }
  func.func @transform_0(%arg0: i32) -> (i32, i32) {
    %c0_i32 = arith.constant 0 : i32
    %c0_i32_0 = arith.constant 0 : i32
    %c0_i32_1 = arith.constant 0 : i32
    return %c0_i32, %c0_i32_0 : i32, i32
  }
  func.func @transform_1(%arg0: i32) -> (i32, i32, i32) {
    %c0_i32 = arith.constant 0 : i32
    %c0_i32_0 = arith.constant 0 : i32
    %c0_i32_1 = arith.constant 0 : i32
    return %arg0, %c0_i32, %c0_i32_0 : i32, i32, i32
  }
  func.func @transform_2(%arg0: i32) -> (i32, i32) {
    %c0_i32 = arith.constant 0 : i32
    %c0_i32_0 = arith.constant 0 : i32
    %c0_i32_1 = arith.constant 0 : i32
    return %c0_i32, %c0_i32_0 : i32, i32
  }
  func.func @transform_3(%arg0: i32) -> (i32, i32) {
    %c0_i32 = arith.constant 0 : i32
    %c0_i32_0 = arith.constant 0 : i32
    %c0_i32_1 = arith.constant 0 : i32
    return %c0_i32, %c0_i32_0 : i32, i32
  }
  func.func @transform_4(%arg0: i32) -> (i32, i32, i32) {
    %c0_i32 = arith.constant 0 : i32
    %c0_i32_0 = arith.constant 0 : i32
    %c0_i32_1 = arith.constant 0 : i32
    return %arg0, %c0_i32, %c0_i32_0 : i32, i32, i32
  }
}

module attributes {stable_mosaic.version = 11 : i64} {
  func.func @_conv_pool_ln_lrelu_kernel(%arg0: i32, %arg1: memref<32x144xbf16, #tpu.memory_space<vmem>>, %arg2: memref<1x144x256xbf16, #tpu.memory_space<vmem>>, %arg3: memref<32x64xf32, #tpu.memory_space<vmem>>, %arg4: memref<32x64xf32, #tpu.memory_space<vmem>>, %arg5: memref<1x32x64xf32, #tpu.memory_space<vmem>>) attributes {dimension_semantics = [#tpu.dimension_semantics<parallel>], iteration_bounds = array<i64: 2>, scalar_prefetch = 0 : i64, scratch_operands = 0 : i64, tpu.core_type = #tpu.core_type<tc>, window_params = [{pipeline_mode = #tpu.pipeline_mode<synchronous>, transform_indices = @transform_0, window_bounds = array<i64: 32, 144>}, {transform_indices = @transform_1, window_bounds = array<i64: 1, 144, 256>}, {pipeline_mode = #tpu.pipeline_mode<synchronous>, transform_indices = @transform_2, window_bounds = array<i64: 32, 64>}, {pipeline_mode = #tpu.pipeline_mode<synchronous>, transform_indices = @transform_3, window_bounds = array<i64: 32, 64>}, {transform_indices = @transform_4, window_bounds = array<i64: 1, 32, 64>}]} {
    %c0 = arith.constant 0 : index
    %c0_0 = arith.constant 0 : index
    %0 = vector.load %arg1[%c0, %c0_0] : memref<32x144xbf16, #tpu.memory_space<vmem>>, vector<32x144xbf16>
    %c0_1 = arith.constant 0 : index
    %c0_2 = arith.constant 0 : index
    %c0_3 = arith.constant 0 : index
    %1 = vector.load %arg2[%c0_1, %c0_2, %c0_3] : memref<1x144x256xbf16, #tpu.memory_space<vmem>>, vector<1x144x256xbf16>
    %2 = vector.shape_cast %1 : vector<1x144x256xbf16> to vector<144x256xbf16>
    %cst = arith.constant dense<0.000000e+00> : vector<32x256xf32>
    %3 = tpu.matmul %0, %2, %cst {dimension_numbers = #tpu.dot_dimension_numbers<[1], [0], [0], [1], [0, 0, 1, 1], [], []>} : vector<32x144xbf16>, vector<144x256xbf16>, vector<32x256xf32> -> vector<32x256xf32>
    %4 = vector.extract_strided_slice %3 {offsets = [0, 0], sizes = [32, 64], strides = [1, 1]} : vector<32x256xf32> to vector<32x64xf32>
    %5 = vector.extract_strided_slice %3 {offsets = [0, 64], sizes = [32, 64], strides = [1, 1]} : vector<32x256xf32> to vector<32x64xf32>
    %6 = arith.maximumf %4, %5 : vector<32x64xf32>
    %7 = vector.extract_strided_slice %3 {offsets = [0, 128], sizes = [32, 64], strides = [1, 1]} : vector<32x256xf32> to vector<32x64xf32>
    %8 = vector.extract_strided_slice %3 {offsets = [0, 192], sizes = [32, 64], strides = [1, 1]} : vector<32x256xf32> to vector<32x64xf32>
    %9 = arith.maximumf %7, %8 : vector<32x64xf32>
    %10 = arith.maximumf %6, %9 : vector<32x64xf32>
    %cst_4 = arith.constant dense<0.000000e+00> : vector<32xf32>
    %11 = vector.multi_reduction <add>, %10, %cst_4 [1] : vector<32x64xf32> to vector<32xf32>
    %12 = vector.shape_cast %11 : vector<32xf32> to vector<32x1xf32>
    %cst_5 = arith.constant 6.400000e+01 : f32
    %13 = vector.broadcast %cst_5 : f32 to vector<32x1xf32>
    %14 = arith.divf %12, %13 : vector<32x1xf32>
    %cst_6 = arith.constant dense<0.000000e+00> : vector<1xf32>
    %15 = vector.multi_reduction <add>, %14, %cst_6 [0] : vector<32x1xf32> to vector<1xf32>
    %16 = vector.shape_cast %15 : vector<1xf32> to vector<1x1xf32>
    %cst_7 = arith.constant 3.200000e+01 : f32
    %17 = vector.broadcast %cst_7 : f32 to vector<1x1xf32>
    %18 = arith.divf %16, %17 : vector<1x1xf32>
    %19 = vector.broadcast %18 : vector<1x1xf32> to vector<32x64xf32>
    %20 = arith.subf %10, %19 : vector<32x64xf32>
    %21 = arith.mulf %20, %20 : vector<32x64xf32>
    %cst_8 = arith.constant dense<0.000000e+00> : vector<32xf32>
    %22 = vector.multi_reduction <add>, %21, %cst_8 [1] : vector<32x64xf32> to vector<32xf32>
    %23 = vector.shape_cast %22 : vector<32xf32> to vector<32x1xf32>
    %cst_9 = arith.constant 6.400000e+01 : f32
    %24 = vector.broadcast %cst_9 : f32 to vector<32x1xf32>
    %25 = arith.divf %23, %24 : vector<32x1xf32>
    %cst_10 = arith.constant dense<0.000000e+00> : vector<1xf32>
    %26 = vector.multi_reduction <add>, %25, %cst_10 [0] : vector<32x1xf32> to vector<1xf32>
    %27 = vector.shape_cast %26 : vector<1xf32> to vector<1x1xf32>
    %cst_11 = arith.constant 3.200000e+01 : f32
    %28 = vector.broadcast %cst_11 : f32 to vector<1x1xf32>
    %29 = arith.divf %27, %28 : vector<1x1xf32>
    %cst_12 = arith.constant 9.99999974E-6 : f32
    %30 = vector.broadcast %cst_12 : f32 to vector<1x1xf32>
    %31 = arith.addf %29, %30 : vector<1x1xf32>
    %32 = math.rsqrt %31 : vector<1x1xf32>
    %33 = vector.broadcast %32 : vector<1x1xf32> to vector<32x64xf32>
    %34 = arith.mulf %20, %33 : vector<32x64xf32>
    %c0_13 = arith.constant 0 : index
    %c0_14 = arith.constant 0 : index
    %35 = vector.load %arg3[%c0_13, %c0_14] : memref<32x64xf32, #tpu.memory_space<vmem>>, vector<32x64xf32>
    %36 = arith.mulf %34, %35 : vector<32x64xf32>
    %c0_15 = arith.constant 0 : index
    %c0_16 = arith.constant 0 : index
    %37 = vector.load %arg4[%c0_15, %c0_16] : memref<32x64xf32, #tpu.memory_space<vmem>>, vector<32x64xf32>
    %38 = arith.addf %36, %37 : vector<32x64xf32>
    %cst_17 = arith.constant 0.00999999977 : f32
    %39 = vector.broadcast %cst_17 : f32 to vector<32x64xf32>
    %40 = arith.mulf %39, %38 : vector<32x64xf32>
    %41 = arith.maximumf %38, %40 : vector<32x64xf32>
    %c0_18 = arith.constant 0 : index
    %c0_19 = arith.constant 0 : index
    %c0_20 = arith.constant 0 : index
    %42 = vector.load %arg5[%c0_18, %c0_19, %c0_20] : memref<1x32x64xf32, #tpu.memory_space<vmem>>, vector<1x32x64xf32>
    %43 = vector.shape_cast %42 : vector<1x32x64xf32> to vector<32x64xf32>
    %44 = vector.shape_cast %41 : vector<32x64xf32> to vector<1x32x64xf32>
    tpu.vector_store %arg5[%c0_18, %c0_19, %c0_20], %44 {strides = array<i32>} : memref<1x32x64xf32, #tpu.memory_space<vmem>>, vector<1x32x64xf32>,
    return
  }
  func.func @transform_0(%arg0: i32) -> (i32, i32) {
    %c0_i32 = arith.constant 0 : i32
    %c0_i32_0 = arith.constant 0 : i32
    %c0_i32_1 = arith.constant 0 : i32
    return %c0_i32, %c0_i32_0 : i32, i32
  }
  func.func @transform_1(%arg0: i32) -> (i32, i32, i32) {
    %c0_i32 = arith.constant 0 : i32
    %c0_i32_0 = arith.constant 0 : i32
    %c0_i32_1 = arith.constant 0 : i32
    return %arg0, %c0_i32, %c0_i32_0 : i32, i32, i32
  }
  func.func @transform_2(%arg0: i32) -> (i32, i32) {
    %c0_i32 = arith.constant 0 : i32
    %c0_i32_0 = arith.constant 0 : i32
    %c0_i32_1 = arith.constant 0 : i32
    return %c0_i32, %c0_i32_0 : i32, i32
  }
  func.func @transform_3(%arg0: i32) -> (i32, i32) {
    %c0_i32 = arith.constant 0 : i32
    %c0_i32_0 = arith.constant 0 : i32
    %c0_i32_1 = arith.constant 0 : i32
    return %c0_i32, %c0_i32_0 : i32, i32
  }
  func.func @transform_4(%arg0: i32) -> (i32, i32, i32) {
    %c0_i32 = arith.constant 0 : i32
    %c0_i32_0 = arith.constant 0 : i32
    %c0_i32_1 = arith.constant 0 : i32
    return %arg0, %c0_i32, %c0_i32_0 : i32, i32, i32
  }
}

module attributes {stable_mosaic.version = 11 : i64} {
  func.func @_head_kernel(%arg0: i32, %arg1: memref<4x2x512xf32, #tpu.memory_space<vmem>>, %arg2: memref<512x64xf32, #tpu.memory_space<vmem>>, %arg3: memref<1x64xf32, #tpu.memory_space<vmem>>, %arg4: memref<64x10xf32, #tpu.memory_space<vmem>>, %arg5: memref<1x10xf32, #tpu.memory_space<vmem>>, %arg6: memref<2x10xf32, #tpu.memory_space<vmem>>) attributes {dimension_semantics = [#tpu.dimension_semantics<parallel>], iteration_bounds = array<i64: 1>, scalar_prefetch = 0 : i64, scratch_operands = 0 : i64, tpu.core_type = #tpu.core_type<tc>, window_params = [{transform_indices = @transform_0, window_bounds = array<i64: 4, 2, 512>}, {pipeline_mode = #tpu.pipeline_mode<synchronous>, transform_indices = @transform_1, window_bounds = array<i64: 512, 64>}, {pipeline_mode = #tpu.pipeline_mode<synchronous>, transform_indices = @transform_2, window_bounds = array<i64: 1, 64>}, {pipeline_mode = #tpu.pipeline_mode<synchronous>, transform_indices = @transform_3, window_bounds = array<i64: 64, 10>}, {pipeline_mode = #tpu.pipeline_mode<synchronous>, transform_indices = @transform_4, window_bounds = array<i64: 1, 10>}, {transform_indices = @transform_5, window_bounds = array<i64: 2, 10>}]} {
    %c0 = arith.constant 0 : index
    %c0_0 = arith.constant 0 : index
    %c0_1 = arith.constant 0 : index
    %0 = vector.load %arg1[%c0, %c0_0, %c0_1] : memref<4x2x512xf32, #tpu.memory_space<vmem>>, vector<1x2x512xf32>
    %1 = vector.shape_cast %0 : vector<1x2x512xf32> to vector<2x512xf32>
    %c1 = arith.constant 1 : index
    %c0_2 = arith.constant 0 : index
    %c0_3 = arith.constant 0 : index
    %2 = vector.load %arg1[%c1, %c0_2, %c0_3] : memref<4x2x512xf32, #tpu.memory_space<vmem>>, vector<1x2x512xf32>
    %3 = vector.shape_cast %2 : vector<1x2x512xf32> to vector<2x512xf32>
    %4 = arith.maximumf %1, %3 : vector<2x512xf32>
    %c2 = arith.constant 2 : index
    %c0_4 = arith.constant 0 : index
    %c0_5 = arith.constant 0 : index
    %5 = vector.load %arg1[%c2, %c0_4, %c0_5] : memref<4x2x512xf32, #tpu.memory_space<vmem>>, vector<1x2x512xf32>
    %6 = vector.shape_cast %5 : vector<1x2x512xf32> to vector<2x512xf32>
    %c3 = arith.constant 3 : index
    %c0_6 = arith.constant 0 : index
    %c0_7 = arith.constant 0 : index
    %7 = vector.load %arg1[%c3, %c0_6, %c0_7] : memref<4x2x512xf32, #tpu.memory_space<vmem>>, vector<1x2x512xf32>
    %8 = vector.shape_cast %7 : vector<1x2x512xf32> to vector<2x512xf32>
    %9 = arith.maximumf %6, %8 : vector<2x512xf32>
    %10 = arith.maximumf %4, %9 : vector<2x512xf32>
    %c0_8 = arith.constant 0 : index
    %c0_9 = arith.constant 0 : index
    %11 = vector.load %arg2[%c0_8, %c0_9] : memref<512x64xf32, #tpu.memory_space<vmem>>, vector<512x64xf32>
    %cst = arith.constant dense<0.000000e+00> : vector<2x64xf32>
    %12 = tpu.matmul %10, %11, %cst {dimension_numbers = #tpu.dot_dimension_numbers<[1], [0], [0], [1], [0, 0, 1, 1], [], []>} : vector<2x512xf32>, vector<512x64xf32>, vector<2x64xf32> -> vector<2x64xf32>
    %c0_10 = arith.constant 0 : index
    %c0_11 = arith.constant 0 : index
    %13 = vector.load %arg3[%c0_10, %c0_11] : memref<1x64xf32, #tpu.memory_space<vmem>>, vector<1x64xf32>
    %14 = vector.broadcast %13 : vector<1x64xf32> to vector<2x64xf32>
    %15 = arith.addf %12, %14 : vector<2x64xf32>
    %cst_12 = arith.constant 0.00999999977 : f32
    %16 = vector.broadcast %cst_12 : f32 to vector<2x64xf32>
    %17 = arith.mulf %16, %15 : vector<2x64xf32>
    %18 = arith.maximumf %15, %17 : vector<2x64xf32>
    %c0_13 = arith.constant 0 : index
    %c0_14 = arith.constant 0 : index
    %19 = vector.load %arg4[%c0_13, %c0_14] : memref<64x10xf32, #tpu.memory_space<vmem>>, vector<64x10xf32>
    %cst_15 = arith.constant dense<0.000000e+00> : vector<2x10xf32>
    %20 = tpu.matmul %18, %19, %cst_15 {dimension_numbers = #tpu.dot_dimension_numbers<[1], [0], [0], [1], [0, 0, 1, 1], [], []>} : vector<2x64xf32>, vector<64x10xf32>, vector<2x10xf32> -> vector<2x10xf32>
    %c0_16 = arith.constant 0 : index
    %c0_17 = arith.constant 0 : index
    %21 = vector.load %arg5[%c0_16, %c0_17] : memref<1x10xf32, #tpu.memory_space<vmem>>, vector<1x10xf32>
    %22 = vector.broadcast %21 : vector<1x10xf32> to vector<2x10xf32>
    %23 = arith.addf %20, %22 : vector<2x10xf32>
    %c0_18 = arith.constant 0 : index
    %c0_19 = arith.constant 0 : index
    %24 = vector.load %arg6[%c0_18, %c0_19] : memref<2x10xf32, #tpu.memory_space<vmem>>, vector<2x10xf32>
    tpu.vector_store %arg6[%c0_18, %c0_19], %23 {strides = array<i32>} : memref<2x10xf32, #tpu.memory_space<vmem>>, vector<2x10xf32>,
    return
  }
  func.func @transform_0(%arg0: i32) -> (i32, i32, i32) {
    %c0_i32 = arith.constant 0 : i32
    %c0_i32_0 = arith.constant 0 : i32
    %c0_i32_1 = arith.constant 0 : i32
    return %c0_i32, %arg0, %c0_i32_0 : i32, i32, i32
  }
  func.func @transform_1(%arg0: i32) -> (i32, i32) {
    %c0_i32 = arith.constant 0 : i32
    %c0_i32_0 = arith.constant 0 : i32
    %c0_i32_1 = arith.constant 0 : i32
    return %c0_i32, %c0_i32_0 : i32, i32
  }
  func.func @transform_2(%arg0: i32) -> (i32, i32) {
    %c0_i32 = arith.constant 0 : i32
    %c0_i32_0 = arith.constant 0 : i32
    %c0_i32_1 = arith.constant 0 : i32
    return %c0_i32, %c0_i32_0 : i32, i32
  }
  func.func @transform_3(%arg0: i32) -> (i32, i32) {
    %c0_i32 = arith.constant 0 : i32
    %c0_i32_0 = arith.constant 0 : i32
    %c0_i32_1 = arith.constant 0 : i32
    return %c0_i32, %c0_i32_0 : i32, i32
  }
  func.func @transform_4(%arg0: i32) -> (i32, i32) {
    %c0_i32 = arith.constant 0 : i32
    %c0_i32_0 = arith.constant 0 : i32
    %c0_i32_1 = arith.constant 0 : i32
    return %c0_i32, %c0_i32_0 : i32, i32
  }
  func.func @transform_5(%arg0: i32) -> (i32, i32) {
    %c0_i32 = arith.constant 0 : i32
    %c0_i32_0 = arith.constant 0 : i32
    return %arg0, %c0_i32 : i32, i32
  }
}

</mosaic_0001>

<bundles_post_ra>
// kernel: cnn_forward.3
= control target key start
LH: loop header
LB: loop body
LE: loop exit
PB: predicated region body
PF: predicated region fallthrough
CT: control target
= control target key end

     0   :  { %s701_s15 = smov 0   ;;  %s771_s0 = inlined_call_operand.vmem [shape: bf16[16,32], index: 0, kind: input, shape index: {}]   ;;  %s772_s1 = inlined_call_operand.vmem [shape: bf16[2,32,1024], index: 1, kind: input, shape index: {}]   ;;  %s773_s2 = inlined_call_operand.vmem [shape: f32[16,256], index: 2, kind: input, shape index: {}]   ;;  %s774_s3 = inlined_call_operand.vmem [shape: f32[16,256], index: 3, kind: input, shape index: {}]   ;;  %s775_s4 = inlined_call_operand.vmem [shape: f32[2,16,256], index: 4, kind: output, shape index: {}]  }
   0x1 LB: > { %s621_s16 = sadd.s32 4294967295, %s673_s15   ;;  %p625_p0 = scmp.ge.s32.totalorder %s673_s15, 1  ;;  %s673_s15 = sphi %s701_s15, %s14_s15  }
   0x2   : > { %p162_p1 = scmp.lt.s32.totalorder %s673_s15, 3 }
   0x4   : > { %p163_p2 = pnand %p625_p0, %p162_p1 }
   0x5   : > { %p188_p3 = scmp.lt.s32.totalorder (!%p163_p2), %s621_s16, 1  ;;  %v675_v0 = vmov (!%p163_p2), 0   ;;  %v664_v25 = vld [vmem:[%s771_s0] sm:$0xff] (!%p163_p2)   ;;  %vm302_vm0 = vcmask (!%p163_p2), 261120  }
   0x6   : > { %166 = sbr.rel (%p163_p2) target bundleno = 614 (0x266), region = 36  ;;  %338 = vmatprep.mubr.bf16.mxu0 (!%p163_p2), %v675_v0  ;;  %381 = vmatprep.mubr.bf16.mxu1 (!%p163_p2), %v675_v0 }
   0xd   : > { %s777_s16 = smov (!%p188_p3, %s621_s16), 1 }
   0xe   : > { %s653_s17 = sshll.u32 %s777_s16, 7  ;;  %s654_s13 = sshll.u32 %s777_s16, 5 }
   0xf   : > { %s715_s20 = scalar_lea.vmem %s772_s1, %s653_s17  ;;  %s197_s18 = scalar_lea.vmem %s775_s4, %s654_s13 }
  0x10   : > { %v201_v1 = vld [vmem:[%s715_s20] sm:$0xff]  ;;  %v202_v3 = vld [vmem:[%s715_s20 + $0x8] sm:$0xff]  ;;  %v203_v14 = vld [vmem:[%s715_s20 + $0x10] sm:$0xff] }
  0x11   : > { %v205_v2 = vld [vmem:[%s715_s20 + $0x20] sm:$0xff]  ;;  %v206_v5 = vld [vmem:[%s715_s20 + $0x28] sm:$0xff]  ;;  %v207_v16 = vld [vmem:[%s715_s20 + $0x30] sm:$0xff] }
  0x12   : > { %v632_v4 = vcombine.high %v201_v1, %v205_v2  ;;  %v631_v6 = vcombine.low %v201_v1, %v205_v2  ;;  %v209_v7 = vld [vmem:[%s715_s20 + $0x40] sm:$0xff]  ;;  %v634_v9 = vcombine.high %v202_v3, %v206_v5  ;;  %v633_v10 = vcombine.low %v202_v3, %v206_v5  ;;  %v210_v12 = vld [vmem:[%s715_s20 + $0x48] sm:$0xff]  ;;  %v204_v17 = vld [vmem:[%s715_s20 + $0x18] sm:$0xff] }
  0x13   : > { %v213_v8 = vld [vmem:[%s715_s20 + $0x60] sm:$0xff]  ;;  %v214_v13 = vld [vmem:[%s715_s20 + $0x68] sm:$0xff]  ;;  %v208_v18 = vld [vmem:[%s715_s20 + $0x38] sm:$0xff]  ;;  %v636_v21 = vcombine.high %v203_v14, %v207_v16  ;;  %v635_v28 = vcombine.low %v203_v14, %v207_v16 }
  0x14   : > { %v640_v11 = vcombine.high %v209_v7, %v213_v8  ;;  %306 = vmatprep.subr.bf16.mxu0 %v632_v4  ;;  %v642_v15 = vcombine.high %v210_v12, %v214_v13  ;;  %349 = vmatprep.subr.bf16.mxu1 %v634_v9  ;;  %v639_v19 = vcombine.low %v209_v7, %v213_v8  ;;  %v211_v23 = vld [vmem:[%s715_s20 + $0x50] sm:$0xff]  ;;  %v212_v26 = vld [vmem:[%s715_s20 + $0x58] sm:$0xff] }
  0x15   : > { %307 = vmatpush1.bf16.msra.mxu0 %v631_v6  ;;  %350 = vmatpush1.bf16.msra.mxu1 %v633_v10  ;;  %v641_v20 = vcombine.low %v210_v12, %v214_v13  ;;  %v638_v22 = vcombine.high %v204_v17, %v208_v18  ;;  %v215_v24 = vld [vmem:[%s715_s20 + $0x70] sm:$0xff]  ;;  %v216_v27 = vld [vmem:[%s715_s20 + $0x78] sm:$0xff]  ;;  %v637_v29 = vcombine.low %v204_v17, %v208_v18 }
  0x16   : > { %308 = vmatprep.subr.bf16.mxu0 %v640_v11  ;;  %351 = vmatprep.subr.bf16.mxu1 %v642_v15  ;;  %v644_v30 = vcombine.high %v211_v23, %v215_v24  ;;  %v646_v31 = vcombine.high %v212_v26, %v216_v27  ;;  %v643_v32 = vcombine.low %v211_v23, %v215_v24 }
  0x17   : > { %v645_v33 = vcombine.low %v212_v26, %v216_v27 }
  0x19   : > { %309 = vmatpush1.bf16.msra.mxu0 %v639_v19  ;;  %352 = vmatpush1.bf16.msra.mxu1 %v641_v20 }
  0x1a   : > { %392 = vmatprep.subr.bf16.mxu0 %v636_v21  ;;  %435 = vmatprep.subr.bf16.mxu1 %v638_v22 }
  0x1c   : > { %647 = vmatmul.mubr.msk.bf16.vlgmr.msra.gmra.mrb[0].mxu0 %vm302_vm0, %v664_v25  ;;  %648 = vmatmul.mubr.msk.bf16.vlgmr.msra.gmra.mrb[0].mxu1 %vm302_vm0, %v664_v25 }
  0x1d   : > { %393 = vmatpush1.bf16.msra.mxu0 %v635_v28  ;;  %436 = vmatpush1.bf16.msra.mxu1 %v637_v29 }
  0x1e   : > { %394 = vmatprep.subr.bf16.mxu0 %v644_v30  ;;  %437 = vmatprep.subr.bf16.mxu1 %v646_v31 }
  0x1f   : > { %424 = vmatprep.mubr.bf16.mxu0 %v675_v0  ;;  %467 = vmatprep.mubr.bf16.mxu1 %v675_v0 }
  0x21   : > { %395 = vmatpush1.bf16.msra.mxu0 %v643_v32  ;;  %438 = vmatpush1.bf16.msra.mxu1 %v645_v33 }
  0x24   : > { %649 = vmatmul.mubr.msk.bf16.vlgmr.msra.gmra.mrb[4].mxu0 %vm302_vm0, %v664_v25  ;;  %650 = vmatmul.mubr.msk.bf16.vlgmr.msra.gmra.mrb[4].mxu1 %vm302_vm0, %v664_v25 }
  0xef   : > { %v340_v34 = vpop.f32.mrb[0].mxu0  ;;  %v383_v35 = vpop.f32.mrb[0].mxu1 }
  0xf0   : > { %v342_v36 = vpop.f32.mrb[1].mxu0  ;;  %v478_v37 = vmax.f32 %v340_v34, %v383_v35  ;;  %v385_v38 = vpop.f32.mrb[1].mxu1  ;;  %v538_v35 = vld [vmem:[%s773_s2] sm:$0xff] }
  0xf1   : > { %v344_v39 = vpop.f32.mrb[2].mxu0  ;;  %v479_v40 = vmax.f32 %v342_v36, %v385_v38  ;;  %v387_v41 = vpop.f32.mrb[2].mxu1  ;;  %v540_v38 = vld [vmem:[%s773_s2 + $0x10] sm:$0xff] }
  0xf2   : > { %v346_v42 = vpop.f32.mrb[3].mxu0  ;;  %v480_v43 = vmax.f32 %v344_v39, %v387_v41  ;;  %v389_v44 = vpop.f32.mrb[3].mxu1  ;;  %v541_v39 = vld [vmem:[%s773_s2 + $0x18] sm:$0xff] }
  0xf3   : > { %v481_v45 = vmax.f32 %v346_v42, %v389_v44 }
  0xf7   : > { %v426_v46 = vpop.f32.mrb[4].mxu0  ;;  %v469_v47 = vpop.f32.mrb[4].mxu1 }
  0xf8   : > { %v428_v48 = vpop.f32.mrb[5].mxu0  ;;  %v482_v49 = vmax.f32 %v426_v46, %v469_v47  ;;  %v471_v50 = vpop.f32.mrb[5].mxu1  ;;  %v548_v46 = vld [vmem:[%s774_s3 + $0x10] sm:$0xff]  ;;  %v549_v47 = vld [vmem:[%s774_s3 + $0x18] sm:$0xff] }
  0xf9   : > { %v430_v51 = vpop.f32.mrb[6].mxu0  ;;  %v483_v52 = vmax.f32 %v428_v48, %v471_v50  ;;  %v473_v53 = vpop.f32.mrb[6].mxu1 }
  0xfa   : > { %v432_v54 = vpop.f32.mrb[7].mxu0  ;;  %v484_v55 = vmax.f32 %v430_v51, %v473_v53  ;;  %v475_v56 = vpop.f32.mrb[7].mxu1  ;;  %v486_v57 = vmax.f32 %v478_v37, %v482_v49  ;;  %v539_v37 = vld [vmem:[%s773_s2 + $0x8] sm:$0xff] }
  0xfb   : > { %v485_v58 = vmax.f32 %v432_v54, %v475_v56  ;;  %v487_v59 = vmax.f32 %v479_v40, %v483_v52  ;;  %v546_v40 = vld [vmem:[%s774_s3] sm:$0xff] }
  0xfc   : > { %v488_v60 = vmax.f32 %v480_v43, %v484_v55 }
  0xfd   : > { %v489_v61 = vmax.f32 %v481_v45, %v485_v58  ;;  %v490_v62 = vadd.f32 %v487_v59, %v486_v57  ;;  %v547_v45 = vld [vmem:[%s774_s3 + $0x8] sm:$0xff] }
  0xff   : > { %491 = vadd.xlane.f32.xlu0 %v490_v62  ;;  %v493_v63 = vadd.f32 %v489_v61, %v488_v60 }
 0x103   : > { %494 = vadd.xlane.f32.xlu0 %v493_v63 }
 0x18c   : > { %v492_v0 = vpop.xlane.xlu0 %491 }
 0x18d   : > { %v497_v2 = vmul.f32 0.00390625, %v492_v0 }
 0x190   : > { %v495_v1 = vpop.xlane.xlu0 %494 }
 0x191   : > { %v498_v3 = vmul.f32 0.00390625, %v495_v1 }
 0x193   : > { %v499_v4 = vadd.f32 %v498_v3, %v497_v2 }
 0x195   : > { %v500_v5 = vrot.slane %v499_v4, 4 }
 0x197   : > { %v501_v6 = vadd.f32 %v500_v5, %v499_v4 }
 0x199   : > { %v502_v7 = vrot.slane %v501_v6, 2 }
 0x19b   : > { %v503_v8 = vadd.f32 %v502_v7, %v501_v6 }
 0x19d   : > { %v504_v9 = vrot.slane %v503_v8, 1 }
 0x19f   : > { %v505_v10 = vadd.f32 %v504_v9, %v503_v8 }
 0x1a1   : > { %v507_v11 = vmul.f32 0.0625, %v505_v10 }
 0x1a3   : > { %v508_v12 = vsub.f32 %v486_v57, %v507_v11  ;;  %v509_v13 = vsub.f32 %v487_v59, %v507_v11  ;;  %v510_v14 = vsub.f32 %v488_v60, %v507_v11  ;;  %v511_v15 = vsub.f32 %v489_v61, %v507_v11 }
 0x1a5   : > { %v512_v16 = vmul.f32 %v508_v12, %v508_v12  ;;  %v513_v17 = vmul.f32 %v509_v13, %v509_v13  ;;  %v514_v19 = vmul.f32 %v510_v14, %v510_v14  ;;  %v515_v20 = vmul.f32 %v511_v15, %v511_v15 }
 0x1a7   : > { %v516_v18 = vadd.f32 %v513_v17, %v512_v16  ;;  %v519_v21 = vadd.f32 %v515_v20, %v514_v19 }
 0x1a9   : > { %517 = vadd.xlane.f32.xlu1 %v516_v18 }
 0x1ad   : > { %520 = vadd.xlane.f32.xlu1 %v519_v21 }
 0x236   : > { %v518_v22 = vpop.xlane.xlu1 %517 }
 0x237   : > { %v522_v24 = vmul.f32 0.00390625, %v518_v22 }
 0x23a   : > { %v521_v23 = vpop.xlane.xlu1 %520 }
 0x23b   : > { %v523_v25 = vmul.f32 0.00390625, %v521_v23 }
 0x23d   : > { %v524_v26 = vadd.f32 %v523_v25, %v522_v24 }
 0x23f   : > { %v525_v27 = vrot.slane %v524_v26, 4 }
 0x241   : > { %v526_v28 = vadd.f32 %v525_v27, %v524_v26 }
 0x243   : > { %v527_v29 = vrot.slane %v526_v28, 2 }
 0x245   : > { %v528_v30 = vadd.f32 %v527_v29, %v526_v28 }
 0x247   : > { %v529_v31 = vrot.slane %v528_v30, 1 }
 0x249   : > { %v530_v32 = vadd.f32 %v529_v31, %v528_v30 }
 0x24b   : > { %v531_v33 = vmul.f32 0.0625, %v530_v32 }
 0x24d   : > { %v532_v34 = vadd.f32 1e-05, %v531_v33 }
 0x24f   : > { %665 = vrsqrt.f32 %v532_v34 }
 0x259   : > { %v666_v36 = vpop.eup %665 }
 0x25a   : > { %v534_v41 = vmul.f32 %v666_v36, %v508_v12  ;;  %v535_v42 = vmul.f32 %v666_v36, %v509_v13  ;;  %v536_v43 = vmul.f32 %v666_v36, %v510_v14  ;;  %v537_v44 = vmul.f32 %v666_v36, %v511_v15 }
 0x25c   : > { %v542_v48 = vmul.f32 %v538_v35, %v534_v41  ;;  %v543_v49 = vmul.f32 %v539_v37, %v535_v42  ;;  %v544_v50 = vmul.f32 %v540_v38, %v536_v43  ;;  %v545_v51 = vmul.f32 %v541_v39, %v537_v44 }
 0x25e   : > { %v550_v52 = vadd.f32 %v546_v40, %v542_v48  ;;  %v551_v53 = vadd.f32 %v547_v45, %v543_v49  ;;  %v552_v54 = vadd.f32 %v548_v46, %v544_v50  ;;  %v553_v55 = vadd.f32 %v549_v47, %v545_v51 }
 0x260   : > { %v554_v56 = vmul.f32 0.01, %v550_v52  ;;  %v555_v57 = vmul.f32 0.01, %v551_v53  ;;  %v556_v58 = vmul.f32 0.01, %v552_v54 }
 0x261   : > { %v557_v59 = vmul.f32 0.01, %v553_v55 }
 0x262   : > { %v558_v60 = vmax.f32 %v550_v52, %v554_v56  ;;  %v559_v61 = vmax.f32 %v551_v53, %v555_v57  ;;  %v560_v62 = vmax.f32 %v552_v54, %v556_v58 }
 0x263   : > { %v561_v63 = vmax.f32 %v553_v55, %v557_v59 }
 0x264   : > { %562 = vst [vmem:[%s197_s18] sm:$0xff] %v558_v60  ;;  %563 = vst [vmem:[%s197_s18 + $0x8] sm:$0xff] %v559_v61 }
 0x265   : > { %564 = vst [vmem:[%s197_s18 + $0x10] sm:$0xff] %v560_v62  ;;  %565 = vst [vmem:[%s197_s18 + $0x18] sm:$0xff] %v561_v63 }
 0x266 PF: > { %s14_s15 = sadd.s32 1, %s673_s15  }
 0x267   : > { %p11_p4 = scmp.ge.s32.totalorder %s14_s15, 4  }
 0x269   :  { %13 = sbr.rel (!%p11_p4) target bundleno = 1 (0x1), region = 66 }

// kernel: cnn_forward.4
= control target key start
LH: loop header
LB: loop body
LE: loop exit
PB: predicated region body
PF: predicated region fallthrough
CT: control target
= control target key end

     0   :  { %s717_s15 = smov 0   ;;  %s806_s0 = inlined_call_operand.vmem [shape: bf16[32,144], index: 0, kind: input, shape index: {}]   ;;  %s807_s1 = inlined_call_operand.vmem [shape: bf16[2,144,256], index: 1, kind: input, shape index: {}]   ;;  %s808_s2 = inlined_call_operand.vmem [shape: f32[32,64], index: 2, kind: input, shape index: {}]   ;;  %s809_s3 = inlined_call_operand.vmem [shape: f32[32,64], index: 3, kind: input, shape index: {}]   ;;  %s810_s4 = inlined_call_operand.vmem [shape: f32[2,32,64], index: 4, kind: output, shape index: {}]  }
   0x1 LB: > { %s585_s16 = sadd.s32 4294967295, %s689_s15   ;;  %p589_p0 = scmp.ge.s32.totalorder %s689_s15, 1  ;;  %s689_s15 = sphi %s717_s15, %s14_s15  }
   0x2   : > { %p162_p1 = scmp.lt.s32.totalorder %s689_s15, 3 }
   0x4   : > { %p163_p2 = pnand %p589_p0, %p162_p1 }
   0x5   : > { %p188_p3 = scmp.lt.s32.totalorder (!%p163_p2), %s585_s16, 1  ;;  %vm329_vm0 = vcmask (!%p163_p2), 130048   ;;  %v677_v0 = vld [vmem:[%s806_s0 + $0x4] ss:$8 sps:$4 sm:$0xff] (!%p163_p2)   ;;  %v680_v1 = vld [vmem:[%s806_s0 + $0x14] ss:$8 sps:$4 sm:$0xff] (!%p163_p2)  }
   0x6   : > { %166 = sbr.rel (%p163_p2) target bundleno = 755 (0x2f3), region = 36  ;;  %615 = vmatprep.mubr.msk.bf16.mxu0 (!%p163_p2), %vm329_vm0, %v677_v0  ;;  %616 = vmatprep.mubr.msk.bf16.mxu1 (!%p163_p2), %vm329_vm0, %v680_v1  ;;  %v675_v20 = vld [vmem:[%s806_s0] ss:$8 sps:$4 sm:$0xff] (!%p163_p2)   ;;  %v678_v21 = vld [vmem:[%s806_s0 + $0x10] ss:$8 sps:$4 sm:$0xff] (!%p163_p2)   ;;  %s691_s29 = smov (!%p163_p2), 64  }
   0x7   : > { %vm433_vm1 = vcmask (!%p163_p2), 523264  }
   0xd   : > { %s812_s16 = smov (!%p188_p3, %s585_s16), 1 }
   0xe   : > { %s638_s21 = smul.u32 144, %s812_s16  ;;  %s619_s22 = sshll.u32 %s812_s16, 5 }
   0xf   : > { %s197_s25 = scalar_lea.vmem %s810_s4, %s619_s22 }
  0x10   : > { %s737_s24 = scalar_lea.vmem %s807_s1, %s638_s21 }
  0x11   : > { %v648_v2 = vld [vmem:[%s737_s24 + $0x4] ss:$8 sps:$4 sm:$0xff]   ;;  %v650_v3 = vld [vmem:[%s737_s24] ss:$8 sps:$4 sm:$0xff]   ;;  %v651_v4 = vld [vmem:[%s737_s24 + $0x14] ss:$8 sps:$4 sm:$0xff]  }
  0x12   : > { %336 = vmatprep.subr.bf16.mxu0 %v648_v2  ;;  %620 = vmatprep.subr.bf16.mxu1 %v648_v2  ;;  %v653_v5 = vld [vmem:[%s737_s24 + $0x10] ss:$8 sps:$4 sm:$0xff]   ;;  %v654_v6 = vld [vmem:[%s737_s24 + $0x24] ss:$8 sps:$4 sm:$0xff]   ;;  %v656_v7 = vld [vmem:[%s737_s24 + $0x20] ss:$8 sps:$4 sm:$0xff]  }
  0x13   : > { %337 = vmatpush1.bf16.msra.mxu0 %v650_v3  ;;  %629 = vmatpush1.bf16.msra.mxu1 %v650_v3  ;;  %v657_v8 = vld [vmem:[%s737_s24 + $0x34] ss:$8 sps:$4 sm:$0xff]   ;;  %v659_v9 = vld [vmem:[%s737_s24 + $0x30] ss:$8 sps:$4 sm:$0xff]   ;;  %v660_v10 = vld [vmem:[%s737_s24 + $0x44] ss:$8 sps:$4 sm:$0xff]  }
  0x14   : > { %338 = vmatprep.subr.bf16.mxu0 %v651_v4  ;;  %621 = vmatprep.subr.bf16.mxu1 %v651_v4  ;;  %v662_v11 = vld [vmem:[%s737_s24 + $0x40] ss:$8 sps:$4 sm:$0xff]   ;;  %v663_v12 = vld [vmem:[%s737_s24 + $0x54] ss:$8 sps:$4 sm:$0xff]   ;;  %v665_v13 = vld [vmem:[%s737_s24 + $0x50] ss:$8 sps:$4 sm:$0xff]  }
  0x15   : > { %v666_v14 = vld [vmem:[%s737_s24 + $0x64] ss:$8 sps:$4 sm:$0xff]   ;;  %v668_v15 = vld [vmem:[%s737_s24 + $0x60] ss:$8 sps:$4 sm:$0xff]   ;;  %v669_v16 = vld [vmem:[%s737_s24 + $0x74] ss:$8 sps:$4 sm:$0xff]  }
  0x16   : > { %v671_v17 = vld [vmem:[%s737_s24 + $0x70] ss:$8 sps:$4 sm:$0xff]   ;;  %v672_v18 = vld [vmem:[%s737_s24 + $0x84] ss:$8 sps:$4 sm:$0xff]   ;;  %v674_v19 = vld [vmem:[%s737_s24 + $0x80] ss:$8 sps:$4 sm:$0xff]  }
  0x17   : > { %339 = vmatpush1.bf16.msra.mxu0 %v653_v5  ;;  %630 = vmatpush1.bf16.msra.mxu1 %v653_v5 }
  0x18   : > { %340 = vmatprep.subr.bf16.mxu0 %v654_v6  ;;  %622 = vmatprep.subr.bf16.mxu1 %v654_v6 }
  0x1b   : > { %341 = vmatpush1.bf16.msra.mxu0 %v656_v7  ;;  %631 = vmatpush1.bf16.msra.mxu1 %v656_v7 }
  0x1c   : > { %342 = vmatprep.subr.bf16.mxu0 %v657_v8  ;;  %623 = vmatprep.subr.bf16.mxu1 %v657_v8 }
  0x1f   : > { %343 = vmatpush1.bf16.msra.mxu0 %v659_v9  ;;  %632 = vmatpush1.bf16.msra.mxu1 %v659_v9 }
  0x20   : > { %344 = vmatprep.subr.bf16.mxu0 %v660_v10  ;;  %624 = vmatprep.subr.bf16.mxu1 %v660_v10 }
  0x23   : > { %345 = vmatpush1.bf16.msra.mxu0 %v662_v11  ;;  %633 = vmatpush1.bf16.msra.mxu1 %v662_v11 }
  0x24   : > { %346 = vmatprep.subr.bf16.mxu0 %v663_v12  ;;  %625 = vmatprep.subr.bf16.mxu1 %v663_v12 }
  0x27   : > { %347 = vmatpush1.bf16.msra.mxu0 %v665_v13  ;;  %634 = vmatpush1.bf16.msra.mxu1 %v665_v13 }
  0x28   : > { %348 = vmatprep.subr.bf16.mxu0 %v666_v14  ;;  %626 = vmatprep.subr.bf16.mxu1 %v666_v14 }
  0x2b   : > { %349 = vmatpush1.bf16.msra.mxu0 %v668_v15  ;;  %635 = vmatpush1.bf16.msra.mxu1 %v668_v15 }
  0x2c   : > { %350 = vmatprep.subr.bf16.mxu0 %v669_v16  ;;  %627 = vmatprep.subr.bf16.mxu1 %v669_v16 }
  0x2f   : > { %351 = vmatpush1.bf16.msra.mxu0 %v671_v17  ;;  %636 = vmatpush1.bf16.msra.mxu1 %v671_v17 }
  0x30   : > { %352 = vmatprep.subr.bf16.mxu0 %v672_v18  ;;  %628 = vmatprep.subr.bf16.mxu1 %v672_v18 }
  0x33   : > { %353 = vmatpush1.bf16.msra.mxu0 %v674_v19  ;;  %637 = vmatpush1.bf16.msra.mxu1 %v674_v19 }
  0x36   : > { %369 = vmatmul.mubr.bf16.vlgmr.msra.gmra.mrb[0].mxu0 %v675_v20  ;;  %379 = vmatmul.mubr.bf16.vlgmr.msra.gmra.mrb[0].mxu1 %v678_v21 }
 0x109   : > { %v370_v22 = vpop.f32.mrb[0].mxu0  ;;  %v380_v23 = vpop.f32.mrb[0].mxu1 }
 0x10a   : > { %393 = vrot.lane.b32.xlu0 %v370_v22, %s691_s29  ;;  %v372_v24 = vpop.f32.mrb[1].mxu0  ;;  %v382_v25 = vpop.f32.mrb[1].mxu1 }
 0x10b   : > { %413 = vrot.lane.b32.xlu1 %v372_v24, %s691_s29  ;;  %v374_v26 = vpop.f32.mrb[2].mxu0  ;;  %v384_v27 = vpop.f32.mrb[2].mxu1 }
 0x10c   : > { %v376_v28 = vpop.f32.mrb[3].mxu0  ;;  %v386_v29 = vpop.f32.mrb[3].mxu1 }
 0x10e   : > { %397 = vrot.lane.b32.xlu0 %v380_v23, %s691_s29 }
 0x10f   : > { %417 = vrot.lane.b32.xlu1 %v382_v25, %s691_s29 }
 0x112   : > { %395 = vrot.lane.b32.xlu0 %v374_v26, %s691_s29 }
 0x113   : > { %415 = vrot.lane.b32.xlu1 %v376_v28, %s691_s29 }
 0x116   : > { %399 = vrot.lane.b32.xlu0 %v384_v27, %s691_s29 }
 0x117   : > { %419 = vrot.lane.b32.xlu1 %v386_v29, %s691_s29 }
 0x17c   : > { %v394_v30 = vpop.permute.xlu0 %393 }
 0x17d   : > { %v405_v31 = vmax.f32 %v370_v22, %v394_v30  ;;  %v414_v32 = vpop.permute.xlu1 %413 }
 0x17e   : > { %v425_v33 = vmax.f32 %v372_v24, %v414_v32 }
 0x180   : > { %v398_v34 = vpop.permute.xlu0 %397  ;;  %v429_v35 = vmax.f32 %v405_v31, %v425_v33 }
 0x181   : > { %v407_v36 = vmax.f32 %v380_v23, %v398_v34  ;;  %v418_v37 = vpop.permute.xlu1 %417 }
 0x182   : > { %v427_v38 = vmax.f32 %v382_v25, %v418_v37  ;;  %v434_v39 = vsel %vm433_vm1, %v429_v35, 0.0 }
 0x183   : > { %435 = vadd.xlane.f32.xlu0 %v434_v39  ;;  %v502_v39 = vld [vmem:[%s808_s2] sm:$0xff] }
 0x184   : > { %v396_v40 = vpop.permute.xlu0 %395  ;;  %v431_v41 = vmax.f32 %v407_v36, %v427_v38 }
 0x185   : > { %v406_v42 = vmax.f32 %v374_v26, %v396_v40  ;;  %v416_v43 = vpop.permute.xlu1 %415 }
 0x186   : > { %v426_v44 = vmax.f32 %v376_v28, %v416_v43  ;;  %v440_v45 = vsel %vm433_vm1, %v431_v41, 0.0  ;;  %v505_v43 = vld [vmem:[%s808_s2 + $0x18] sm:$0xff] }
 0x187   : > { %441 = vadd.xlane.f32.xlu0 %v440_v45 }
 0x188   : > { %v400_v46 = vpop.permute.xlu0 %399  ;;  %v430_v47 = vmax.f32 %v406_v42, %v426_v44  ;;  %v504_v42 = vld [vmem:[%s808_s2 + $0x10] sm:$0xff]  ;;  %v510_v44 = vld [vmem:[%s809_s3] sm:$0xff] }
 0x189   : > { %v408_v48 = vmax.f32 %v384_v27, %v400_v46  ;;  %v420_v49 = vpop.permute.xlu1 %419 }
 0x18a   : > { %v428_v50 = vmax.f32 %v386_v29, %v420_v49  ;;  %v437_v51 = vsel %vm433_vm1, %v430_v47, 0.0  ;;  %v511_v49 = vld [vmem:[%s809_s3 + $0x8] sm:$0xff] }
 0x18b   : > { %438 = vadd.xlane.f32.xlu1 %v437_v51  ;;  %v513_v51 = vld [vmem:[%s809_s3 + $0x18] sm:$0xff] }
 0x18c   : > { %v432_v52 = vmax.f32 %v408_v48, %v428_v50  ;;  %v512_v50 = vld [vmem:[%s809_s3 + $0x10] sm:$0xff] }
 0x18e   : > { %v443_v53 = vsel %vm433_vm1, %v432_v52, 0.0 }
 0x18f   : > { %444 = vadd.xlane.f32.xlu0 %v443_v53 }
 0x210   : > { %v436_v54 = vpop.xlane.xlu0 %435 }
 0x211   : > { %v447_v57 = vmul.f32 0.015625, %v436_v54 }
 0x214   : > { %v442_v55 = vpop.xlane.xlu0 %441 }
 0x215   : > { %v449_v59 = vmul.f32 0.015625, %v442_v55 }
 0x218   : > { %v439_v56 = vpop.xlane.xlu1 %438 }
 0x219   : > { %v448_v58 = vmul.f32 0.015625, %v439_v56 }
 0x21b   : > { %v451_v60 = vadd.f32 %v448_v58, %v447_v57 }
 0x21c   : > { %v445_v61 = vpop.xlane.xlu0 %444 }
 0x21d   : > { %v450_v62 = vmul.f32 0.015625, %v445_v61  ;;  %v452_v63 = vadd.f32 %v451_v60, %v449_v59 }
 0x21f   : > { %v453_v0 = vadd.f32 %v452_v63, %v450_v62 }
 0x221   : > { %v454_v1 = vrot.slane %v453_v0, 4 }
 0x223   : > { %v455_v2 = vadd.f32 %v454_v1, %v453_v0 }
 0x225   : > { %v456_v3 = vrot.slane %v455_v2, 2 }
 0x227   : > { %v457_v4 = vadd.f32 %v456_v3, %v455_v2 }
 0x229   : > { %v458_v5 = vrot.slane %v457_v4, 1 }
 0x22b   : > { %v459_v6 = vadd.f32 %v458_v5, %v457_v4 }
 0x22d   : > { %v461_v7 = vmul.f32 0.03125, %v459_v6 }
 0x22f   : > { %v463_v8 = vsub.f32 %v430_v47, %v461_v7  ;;  %v462_v9 = vsub.f32 %v429_v35, %v461_v7  ;;  %v465_v10 = vsub.f32 %v432_v52, %v461_v7  ;;  %v464_v11 = vsub.f32 %v431_v41, %v461_v7  ;;  %v503_v41 = vld [vmem:[%s808_s2 + $0x8] sm:$0xff] }
 0x231   : > { %v467_v12 = vmul.f32 %v463_v8, %v463_v8  ;;  %v466_v13 = vmul.f32 %v462_v9, %v462_v9  ;;  %v469_v16 = vmul.f32 %v465_v10, %v465_v10  ;;  %v468_v17 = vmul.f32 %v464_v11, %v464_v11 }
 0x233   : > { %v473_v14 = vsel %vm433_vm1, %v467_v12, 0.0  ;;  %v470_v15 = vsel %vm433_vm1, %v466_v13, 0.0  ;;  %v479_v18 = vsel %vm433_vm1, %v469_v16, 0.0  ;;  %v476_v19 = vsel %vm433_vm1, %v468_v17, 0.0 }
 0x234   : > { %474 = vadd.xlane.f32.xlu0 %v473_v14  ;;  %471 = vadd.xlane.f32.xlu1 %v470_v15 }
 0x238   : > { %480 = vadd.xlane.f32.xlu0 %v479_v18  ;;  %477 = vadd.xlane.f32.xlu1 %v476_v19 }
 0x2c1   : > { %v475_v20 = vpop.xlane.xlu0 %474  ;;  %v472_v21 = vpop.xlane.xlu1 %471 }
 0x2c2   : > { %v483_v22 = vmul.f32 0.015625, %v475_v20  ;;  %v482_v23 = vmul.f32 0.015625, %v472_v21 }
 0x2c4   : > { %v486_v26 = vadd.f32 %v483_v22, %v482_v23 }
 0x2c5   : > { %v481_v24 = vpop.xlane.xlu0 %480  ;;  %v478_v25 = vpop.xlane.xlu1 %477 }
 0x2c6   : > { %v484_v27 = vmul.f32 0.015625, %v478_v25  ;;  %v485_v28 = vmul.f32 0.015625, %v481_v24 }
 0x2c8   : > { %v487_v29 = vadd.f32 %v486_v26, %v484_v27 }
 0x2ca   : > { %v488_v30 = vadd.f32 %v487_v29, %v485_v28 }
 0x2cc   : > { %v489_v31 = vrot.slane %v488_v30, 4 }
 0x2ce   : > { %v490_v32 = vadd.f32 %v489_v31, %v488_v30 }
 0x2d0   : > { %v491_v33 = vrot.slane %v490_v32, 2 }
 0x2d2   : > { %v492_v34 = vadd.f32 %v491_v33, %v490_v32 }
 0x2d4   : > { %v493_v35 = vrot.slane %v492_v34, 1 }
 0x2d6   : > { %v494_v36 = vadd.f32 %v493_v35, %v492_v34 }
 0x2d8   : > { %v495_v37 = vmul.f32 0.03125, %v494_v36 }
 0x2da   : > { %v496_v38 = vadd.f32 1e-05, %v495_v37 }
 0x2dc   : > { %681 = vrsqrt.f32 %v496_v38 }
 0x2e6   : > { %v682_v40 = vpop.eup %681 }
 0x2e7   : > { %v498_v45 = vmul.f32 %v682_v40, %v462_v9  ;;  %v499_v46 = vmul.f32 %v682_v40, %v463_v8  ;;  %v500_v47 = vmul.f32 %v682_v40, %v464_v11  ;;  %v501_v48 = vmul.f32 %v682_v40, %v465_v10 }
 0x2e9   : > { %v506_v52 = vmul.f32 %v502_v39, %v498_v45  ;;  %v507_v53 = vmul.f32 %v503_v41, %v499_v46  ;;  %v508_v54 = vmul.f32 %v504_v42, %v500_v47  ;;  %v509_v55 = vmul.f32 %v505_v43, %v501_v48 }
 0x2eb   : > { %v514_v56 = vadd.f32 %v510_v44, %v506_v52  ;;  %v515_v57 = vadd.f32 %v511_v49, %v507_v53  ;;  %v516_v58 = vadd.f32 %v512_v50, %v508_v54  ;;  %v517_v59 = vadd.f32 %v513_v51, %v509_v55 }
 0x2ed   : > { %v518_v60 = vmul.f32 0.01, %v514_v56  ;;  %v519_v61 = vmul.f32 0.01, %v515_v57  ;;  %v520_v62 = vmul.f32 0.01, %v516_v58 }
 0x2ee   : > { %v521_v63 = vmul.f32 0.01, %v517_v59 }
 0x2ef   : > { %v522_v0 = vmax.f32 %v514_v56, %v518_v60  ;;  %v523_v1 = vmax.f32 %v515_v57, %v519_v61  ;;  %v524_v2 = vmax.f32 %v516_v58, %v520_v62 }
 0x2f0   : > { %v525_v3 = vmax.f32 %v517_v59, %v521_v63 }
 0x2f1   : > { %526 = vst.msk [vmem:[%s197_s25] sm:$0xff] %vm433_vm1, %v522_v0  ;;  %527 = vst.msk [vmem:[%s197_s25 + $0x8] sm:$0xff] %vm433_vm1, %v523_v1 }
 0x2f2   : > { %528 = vst.msk [vmem:[%s197_s25 + $0x10] sm:$0xff] %vm433_vm1, %v524_v2  ;;  %529 = vst.msk [vmem:[%s197_s25 + $0x18] sm:$0xff] %vm433_vm1, %v525_v3 }
 0x2f3 PF: > { %s14_s15 = sadd.s32 1, %s689_s15  }
 0x2f4   : > { %p11_p4 = scmp.ge.s32.totalorder %s14_s15, 4  }
 0x2f6   :  { %13 = sbr.rel (!%p11_p4) target bundleno = 1 (0x1), region = 66 }

// kernel: cnn_forward.5
= control target key start
LH: loop header
LB: loop body
LE: loop exit
PB: predicated region body
PF: predicated region fallthrough
CT: control target
= control target key end

     0   :  { %v580_v62 = vmov 1983009808   ;;  %s861_s0 = inlined_call_operand.vmem [shape: f32[4,2,512], index: 0, kind: input, shape index: {}]   ;;  %s862_s1 = inlined_call_operand.vmem [shape: f32[512,64], index: 1, kind: input, shape index: {}]   ;;  %s863_s2 = inlined_call_operand.vmem [shape: f32[1,64], index: 2, kind: input, shape index: {}]   ;;  %s864_s3 = inlined_call_operand.vmem [shape: f32[64,10], index: 3, kind: input, shape index: {}]   ;;  %s865_s4 = inlined_call_operand.vmem [shape: f32[1,10], index: 4, kind: input, shape index: {}]   ;;  %s866_s5 = inlined_call_operand.hbm [shape: f32[2,10], index: 5, kind: output, shape index: {}]  }
   0x1   :  { %v47_v0 = vld [vmem:[%s862_s1 + $0x80] sm:$0xff]  ;;  %v48_v1 = vld [vmem:[%s862_s1 + $0x88] sm:$0xff]  ;;  %v49_v11 = vld [vmem:[%s862_s1 + $0x90] sm:$0xff]  ;;  %v105_v63 = vunpack.c.l.s4 %v580_v62 }
   0x2   :  { %v31_v2 = vld [vmem:[%s862_s1] sm:$0xff]  ;;  %v475_v3 = vpack.c.bf16 %v48_v1, %v47_v0  ;;  %v32_v4 = vld [vmem:[%s862_s1 + $0x8] sm:$0xff]  ;;  %v50_v13 = vld [vmem:[%s862_s1 + $0x98] sm:$0xff]  ;;  %v107_v0 = vlaneseq }
   0x3   :  { %v79_v5 = vld [vmem:[%s862_s1 + $0x180] sm:$0xff]  ;;  %v80_v6 = vld [vmem:[%s862_s1 + $0x188] sm:$0xff]  ;;  %v477_v7 = vpack.c.bf16 %v32_v4, %v31_v2  ;;  %v33_v14 = vld [vmem:[%s862_s1 + $0x10] sm:$0xff]  ;;  %v479_v16 = vpack.c.bf16 %v50_v13, %v49_v11 }
   0x4   :  { %v507_v8 = vpack.c.bf16 %v80_v6, %v79_v5  ;;  %v63_v9 = vld [vmem:[%s862_s1 + $0x100] sm:$0xff]  ;;  %v64_v10 = vld [vmem:[%s862_s1 + $0x108] sm:$0xff]  ;;  %476 = vmatprep.subr.bf16.mxu0 %v475_v3  ;;  %v34_v15 = vld [vmem:[%s862_s1 + $0x18] sm:$0xff] }
   0x5   :  { %v509_v12 = vpack.c.bf16 %v64_v10, %v63_v9  ;;  %478 = vmatpush3.bf16.msra.mxu0 %v477_v7  ;;  %v481_v17 = vpack.c.bf16 %v34_v15, %v33_v14  ;;  %v81_v18 = vld [vmem:[%s862_s1 + $0x190] sm:$0xff]  ;;  %v82_v19 = vld [vmem:[%s862_s1 + $0x198] sm:$0xff]  ;;  %v51_v23 = vld [vmem:[%s862_s1 + $0xa0] sm:$0xff]  ;;  %v106_v14 = vunpack.c.0.s8 %v105_v63  ;;  %v108_v15 = vshrl.u32 %v107_v0, 7 }
   0x6   :  { %508 = vmatprep.subr.bf16.mxu1 %v507_v8  ;;  %v65_v20 = vld [vmem:[%s862_s1 + $0x110] sm:$0xff]  ;;  %v511_v21 = vpack.c.bf16 %v82_v19, %v81_v18  ;;  %v66_v22 = vld [vmem:[%s862_s1 + $0x118] sm:$0xff]  ;;  %v52_v24 = vld [vmem:[%s862_s1 + $0xa8] sm:$0xff]  ;;  %480 = vmatprep.subr.bf16.mxu0 %v479_v16 }
   0x7   :  { %510 = vmatpush3.bf16.msra.mxu1 %v509_v12  ;;  %v513_v25 = vpack.c.bf16 %v66_v22, %v65_v20  ;;  %v483_v26 = vpack.c.bf16 %v52_v24, %v51_v23  ;;  %v35_v27 = vld [vmem:[%s862_s1 + $0x20] sm:$0xff]  ;;  %v36_v28 = vld [vmem:[%s862_s1 + $0x28] sm:$0xff]  ;;  %v53_v35 = vld [vmem:[%s862_s1 + $0xb0] sm:$0xff] }
   0x8   :  { %v83_v29 = vld [vmem:[%s862_s1 + $0x1a0] sm:$0xff]  ;;  %512 = vmatprep.subr.bf16.mxu1 %v511_v21  ;;  %v84_v30 = vld [vmem:[%s862_s1 + $0x1a8] sm:$0xff]  ;;  %v485_v33 = vpack.c.bf16 %v36_v28, %v35_v27  ;;  %v54_v36 = vld [vmem:[%s862_s1 + $0xb8] sm:$0xff] }
   0x9   :  { %v67_v31 = vld [vmem:[%s862_s1 + $0x120] sm:$0xff]  ;;  %v68_v32 = vld [vmem:[%s862_s1 + $0x128] sm:$0xff]  ;;  %482 = vmatpush3.bf16.msra.mxu0 %v481_v17  ;;  %v515_v34 = vpack.c.bf16 %v84_v30, %v83_v29  ;;  %v37_v37 = vld [vmem:[%s862_s1 + $0x30] sm:$0xff]  ;;  %v487_v39 = vpack.c.bf16 %v54_v36, %v53_v35 }
   0xa   :  { %484 = vmatprep.subr.bf16.mxu0 %v483_v26  ;;  %v517_v38 = vpack.c.bf16 %v68_v32, %v67_v31  ;;  %v38_v40 = vld [vmem:[%s862_s1 + $0x38] sm:$0xff]  ;;  %v85_v41 = vld [vmem:[%s862_s1 + $0x1b0] sm:$0xff]  ;;  %v55_v46 = vld [vmem:[%s862_s1 + $0xc0] sm:$0xff] }
   0xb   :  { %514 = vmatpush3.bf16.msra.mxu1 %v513_v25  ;;  %v86_v42 = vld [vmem:[%s862_s1 + $0x1b8] sm:$0xff]  ;;  %v69_v44 = vld [vmem:[%s862_s1 + $0x130] sm:$0xff]  ;;  %v56_v47 = vld [vmem:[%s862_s1 + $0xc8] sm:$0xff]  ;;  %v489_v48 = vpack.c.bf16 %v38_v40, %v37_v37 }
   0xc   :  { %516 = vmatprep.subr.bf16.mxu1 %v515_v34  ;;  %v519_v43 = vpack.c.bf16 %v86_v42, %v85_v41  ;;  %v70_v45 = vld [vmem:[%s862_s1 + $0x138] sm:$0xff]  ;;  %v87_v49 = vld [vmem:[%s862_s1 + $0x1c0] sm:$0xff]  ;;  %v88_v50 = vld [vmem:[%s862_s1 + $0x1c8] sm:$0xff]  ;;  %v491_v52 = vpack.c.bf16 %v56_v47, %v55_v46 }
   0xd   :  { %486 = vmatpush3.bf16.msra.mxu0 %v485_v33  ;;  %v521_v51 = vpack.c.bf16 %v70_v45, %v69_v44  ;;  %v39_v53 = vld [vmem:[%s862_s1 + $0x40] sm:$0xff]  ;;  %v40_v54 = vld [vmem:[%s862_s1 + $0x48] sm:$0xff]  ;;  %v523_v56 = vpack.c.bf16 %v88_v50, %v87_v49  ;;  %v57_v58 = vld [vmem:[%s862_s1 + $0xd0] sm:$0xff]  ;;  %v109_v33 = vsub.s32 %v106_v14, %v108_v15 }
   0xe   :  { %488 = vmatprep.subr.bf16.mxu0 %v487_v39  ;;  %v71_v55 = vld [vmem:[%s862_s1 + $0x140] sm:$0xff]  ;;  %v72_v57 = vld [vmem:[%s862_s1 + $0x148] sm:$0xff]  ;;  %v58_v59 = vld [vmem:[%s862_s1 + $0xd8] sm:$0xff]  ;;  %v493_v1 = vpack.c.bf16 %v40_v54, %v39_v53 }
   0xf   :  { %518 = vmatpush3.bf16.msra.mxu1 %v517_v38  ;;  %v89_v60 = vld [vmem:[%s862_s1 + $0x1d0] sm:$0xff]  ;;  %v90_v61 = vld [vmem:[%s862_s1 + $0x1d8] sm:$0xff]  ;;  %v525_v2 = vpack.c.bf16 %v72_v57, %v71_v55  ;;  %v495_v3 = vpack.c.bf16 %v58_v59, %v57_v58  ;;  %v59_v9 = vld [vmem:[%s862_s1 + $0xe0] sm:$0xff] }
  0x10   :  { %520 = vmatprep.subr.bf16.mxu1 %v519_v43  ;;  %v41_v4 = vld [vmem:[%s862_s1 + $0x50] sm:$0xff]  ;;  %v42_v5 = vld [vmem:[%s862_s1 + $0x58] sm:$0xff]  ;;  %v527_v7 = vpack.c.bf16 %v90_v61, %v89_v60  ;;  %v60_v10 = vld [vmem:[%s862_s1 + $0xe8] sm:$0xff] }
  0x11   :  { %490 = vmatpush3.bf16.msra.mxu0 %v489_v48  ;;  %v73_v6 = vld [vmem:[%s862_s1 + $0x150] sm:$0xff]  ;;  %v74_v8 = vld [vmem:[%s862_s1 + $0x158] sm:$0xff]  ;;  %v43_v11 = vld [vmem:[%s862_s1 + $0x60] sm:$0xff]  ;;  %v497_v16 = vpack.c.bf16 %v42_v5, %v41_v4  ;;  %v499_v21 = vpack.c.bf16 %v60_v10, %v59_v9 }
  0x12   :  { %492 = vmatprep.subr.bf16.mxu0 %v491_v52  ;;  %v91_v12 = vld [vmem:[%s862_s1 + $0x1e0] sm:$0xff]  ;;  %v92_v13 = vld [vmem:[%s862_s1 + $0x1e8] sm:$0xff]  ;;  %v529_v20 = vpack.c.bf16 %v74_v8, %v73_v6  ;;  %v61_v22 = vld [vmem:[%s862_s1 + $0xf0] sm:$0xff] }
  0x13   :  { %522 = vmatpush3.bf16.msra.mxu1 %v521_v51  ;;  %v44_v17 = vld [vmem:[%s862_s1 + $0x68] sm:$0xff]  ;;  %v75_v18 = vld [vmem:[%s862_s1 + $0x160] sm:$0xff]  ;;  %v531_v25 = vpack.c.bf16 %v92_v13, %v91_v12  ;;  %v62_v26 = vld [vmem:[%s862_s1 + $0xf8] sm:$0xff] }
  0x14   :  { %524 = vmatprep.subr.bf16.mxu1 %v523_v56  ;;  %v76_v19 = vld [vmem:[%s862_s1 + $0x168] sm:$0xff]  ;;  %v21_v23 = vld [vmem:[%s861_s0] sm:$0xff]  ;;  %v372_v28 = vld [vmem:[%s861_s0 + $0x10] sm:$0xff] }
  0x15   :  { %494 = vmatpush3.bf16.msra.mxu0 %v493_v1  ;;  %v371_v24 = vld [vmem:[%s861_s0 + $0x8] sm:$0xff]  ;;  %v373_v29 = vld [vmem:[%s861_s0 + $0x18] sm:$0xff]  ;;  %v93_v30 = vld [vmem:[%s862_s1 + $0x1f0] sm:$0xff] }
  0x16   :  { %496 = vmatprep.subr.bf16.mxu0 %v495_v3  ;;  %v24_v27 = vmax.f32 %v21_v23, %v371_v24  ;;  %v94_v31 = vld [vmem:[%s862_s1 + $0x1f8] sm:$0xff]  ;;  %v29_v32 = vmax.f32 %v372_v28, %v373_v29 }
  0x17   :  { %526 = vmatpush3.bf16.msra.mxu1 %v525_v2 }
  0x18   :  { %528 = vmatprep.subr.bf16.mxu1 %v527_v7 }
  0x19   :  { %10 = vsyncpa [#allocation3], 0  ;;  %498 = vmatpush3.bf16.msra.mxu0 %v497_v16  ;;  %v501_v34 = vpack.c.bf16 %v44_v17, %v43_v11  ;;  %v533_v35 = vpack.c.bf16 %v76_v19, %v75_v18  ;;  %v503_v36 = vpack.c.bf16 %v62_v26, %v61_v22  ;;  %v45_v37 = vld [vmem:[%s862_s1 + $0x70] sm:$0xff]  ;;  %v46_v38 = vld [vmem:[%s862_s1 + $0x78] sm:$0xff]  ;;  %v30_v39 = vmax.f32 %v24_v27, %v29_v32  ;;  %s584_s21 = smov [#allocation2]  }
  0x1a   :  { %500 = vmatprep.subr.bf16.mxu0 %v499_v21  ;;  %v535_v40 = vpack.c.bf16 %v94_v31, %v93_v30  ;;  %v77_v41 = vld [vmem:[%s862_s1 + $0x170] sm:$0xff]  ;;  %v78_v42 = vld [vmem:[%s862_s1 + $0x178] sm:$0xff]  ;;  %v505_v45 = vpack.c.bf16 %v46_v38, %v45_v37  ;;  %v266_v49 = vld [vmem:[%s864_s3] sm:$0xff]  ;;  %v581_v53 = vmov 0.0|0.0   ;;  %vm582_vm0 = vmmov 0   ;;  %s363_s22 = sshll.u32 %s584_s21, 4  ;;  %s364_s22 = int_to_ptr.vmem [resolvable:$true] %s363_s22 }
  0x1b   :  { %530 = vmatpush3.bf16.msra.mxu1 %v529_v20  ;;  %v110_v43 = vrot.slane %v30_v39, %v109_v33  ;;  %v103_v44 = vcombine.high %v30_v39, %v30_v39  ;;  %v537_v46 = vpack.c.bf16 %v78_v42, %v77_v41  ;;  %v267_v50 = vld [vmem:[%s864_s3 + $0x8] sm:$0xff]  ;;  %v268_v54 = vld [vmem:[%s864_s3 + $0x10] sm:$0xff]  ;;  %v269_v55 = vld [vmem:[%s864_s3 + $0x18] sm:$0xff]  ;;  %v583_v63 = vmov 0.0   ;;  %p561_p1 = scmp.lt.s32.totalorder %s364_s22, %s364_s22 }
  0x1c   :  { %532 = vmatprep.subr.bf16.mxu1 %v531_v25  ;;  %v540_v52 = vpack.c.bf16 %v267_v50, %v266_v49  ;;  %v543_v56 = vpack.c.bf16 %v269_v55, %v268_v54  ;;  %v270_v57 = vld [vmem:[%s864_s3 + $0x20] sm:$0xff]  ;;  %v271_v58 = vld [vmem:[%s864_s3 + $0x28] sm:$0xff]  ;;  %v272_v60 = vld [vmem:[%s864_s3 + $0x30] sm:$0xff]  ;;  %vm281_vm1 = vcmask 523264   ;;  %vm355_vm2 = vcmask 74752  }
  0x1d   :  { %502 = vmatpush3.bf16.msra.mxu0 %v501_v34  ;;  %v118_v47 = vcombine.high %v110_v43, %v110_v43  ;;  %v117_v48 = vrot.slane %v103_v44, %v109_v33  ;;  %v546_v59 = vpack.c.bf16 %v271_v58, %v270_v57  ;;  %v273_v61 = vld [vmem:[%s864_s3 + $0x38] sm:$0xff]  ;;  %v374_v1 = vld [vmem:[%s863_s2] ss:$0 sm:$0xff]  ;;  %s556_s2 = scalar_lea.vmem %s364_s22, 32 }
  0x1e   :  { %504 = vmatprep.subr.bf16.mxu0 %v503_v36  ;;  %v549_v62 = vpack.c.bf16 %v273_v61, %v272_v60  ;;  %v375_v11 = vld [vmem:[%s865_s4] ss:$0 sm:$0xff]  ;;  %p557_p0 = scmp.ne.s32.totalorder %s364_s22, %s556_s2  ;;  %p562_p2 = scmp.lt.s32.totalorder %s556_s2, %s556_s2 }
  0x1f   :  { %534 = vmatpush3.bf16.msra.mxu1 %v533_v35  ;;  %188 = vmatprep.mubr.f32.mxu0 %v118_v47  ;;  %v119_v51 = vcombine.high %v117_v48, %v117_v48 }
  0x20   :  { %536 = vmatprep.subr.bf16.mxu1 %v535_v40  ;;  %p563_p3 = por %p562_p2, %p561_p1 }
  0x21   :  { %506 = vmatpush3.bf16.msra.mxu0 %v505_v45  ;;  %258 = vmatprep.mubr.f32.mxu1 %v119_v51 }
  0x22   :  { %539 = vmatprep.subr.bf16.mxu0 %v581_v53  ;;  %p564_p4 = pnand %p563_p3, %p557_p0 }
  0x23   :  { %538 = vmatpush3.bf16.msra.mxu1 %v537_v46 }
  0x24   :  { %189 = vmatmul.mubr.f32.vlgmr.msra.gmra.mrb[0].mxu0 %v110_v43 }
  0x25   :  { %541 = vmatpush3.bf16.msra.mxu0 %v540_v52  ;;  %472 = vmatprep.mubr.msk.f32.mxu0 %vm582_vm0, %v583_v63 }
  0x26   :  { %259 = vmatmul.mubr.f32.vlgmr.msra.gmra.mrb[0].mxu1 %v117_v48  ;;  %542 = vmatprep.subr.bf16.mxu0 %v581_v53 }
  0x29   :  { %544 = vmatpush3.bf16.msra.mxu0 %v543_v56 }
  0x2a   :  { %545 = vmatprep.subr.bf16.mxu0 %v581_v53 }
  0x2d   :  { %547 = vmatpush3.bf16.msra.mxu0 %v546_v59 }
  0x2e   :  { %548 = vmatprep.subr.bf16.mxu0 %v581_v53 }
  0x31   :  { %550 = vmatpush3.bf16.msra.mxu0 %v549_v62 }
  0xf7   :  { %v409_v0 = vpop.f32.mrb[0].mxu0 }
  0xf8   :  { %v410_v2 = vpop.f32.mrb[1].mxu0 }
  0xf9   :  { %v444_v3 = vpop.f32.mrb[0].mxu1  ;;  %v411_v4 = vadd.f32 %v410_v2, %v409_v0 }
  0xfa   :  { %v445_v5 = vpop.f32.mrb[1].mxu1 }
  0xfb   :  { %v446_v6 = vadd.f32 %v445_v5, %v444_v3  ;;  %v191_v7 = vadd.f32 %v411_v4, %v374_v1 }
  0xfd   :  { %v261_v8 = vadd.f32 %v446_v6, %v191_v7 }
  0xff   :  { %v264_v9 = vmul.f32 0.01, %v261_v8 }
 0x101   :  { %v265_v10 = vmax.f32 %v261_v8, %v264_v9 }
 0x103   :  { %473 = vmatmul.mubr.msk.f32.vlgmr.msra.gmra.mrb[2].mxu0 %vm281_vm1, %v265_v10 }
 0x1d6   :  { %v351_v12 = vpop.f32.mrb[2].mxu0 }
 0x1d7   :  { %v352_v13 = vadd.f32 %v375_v11, %v351_v12  ;;  %v474_v14 = vpop.f32.mrb[3].mxu0 }
 0x1d9   :  { %356 = vst.msk [vmem:[#allocation2] sm:$0x3] %vm355_vm2, %v352_v13 }
 0x1da   :  { %567 = shalt.err (!%p564_p4)
}
 0x1db   :  { %s568_s24 = scalar_lea.hbm %s866_s5, 32 }
 0x1dc   :  { %p569_p5 = scmp.ne.s32.totalorder %s866_s5, %s568_s24  ;;  %p572_p6 = scmp.lt.u32.totalorder %s568_s24, %s866_s5 }
 0x1de   :  { %p574_p7 = pnand %p572_p6, %p569_p5 }
 0x1e0   :  { %577 = shalt.err (!%p574_p7)
}
 0x1e1   :  { %366 = dma.vmem_to_hbm [thread:$0]  %s364_s22, 32, %s866_s5, [#allocation3]  }
 0x1e2   :  { %578 = dma.done.wait [#allocation3], 32  }
 0x1e3   :  { %579 = vsyncadd [#allocation3], 4294967264 }
 0x1e4   :  { %370 = vsyncpa [#allocation3], 1 }

</bundles_post_ra>
